<compile_context>
chip_gen: v7x
topology: tpu7x:2x2x1
jax: 0.10.0
libtpu: 0.0.40
codegen_flags: <defaults>
</compile_context>

<pallas_src>
import functools

import jax
import jax.numpy as jnp
import numpy as np
from jax import lax
from jax.experimental import pallas as pl
from jax.experimental.pallas import tpu as pltpu

EPS = 1e-5


# --------------------------------------------------------------------------------------
# Shared in-kernel math
# --------------------------------------------------------------------------------------
def _chan_combine(n_a, sum_a, m2_a, n_b, sum_b, ss_b):
    """Chan parallel-variance combine of running (n_a, sum_a, m2_a) with a new chunk.

    Exact (no E[x^2]-E[x]^2 cancellation hazard).  n_a may be 0 (first chunk).
    """
    n_a = jnp.asarray(n_a, jnp.float32)
    n_b = jnp.asarray(n_b, jnp.float32)
    mean_a = sum_a / jnp.maximum(n_a, 1.0)
    mean_b = sum_b / n_b
    delta = mean_b - mean_a
    coeff = n_a * n_b / (n_a + n_b)
    return sum_a + sum_b, m2_a + ss_b + delta * delta * coeff


def _per_channel_scale_bias(sum_c, ss_c, gr0, gr1, beta, *, n_in, n_ch, eps):
    """Fused per-channel scale/bias from per-channel partial sums.

    sum_c, ss_c: (C, 1) per-channel sum and centered sum-of-squares over H*W.
    gr0, gr1:    (C, 1) gamma * softmax(rho)[..., 0], gamma * softmax(rho)[..., 1].
    beta:        (C, 1).
    Returns (scale_c, bias_c), both (C, 1), such that out = x * scale_c + bias_c.
    Note: unbiased (n-1) variance assumes HW > 1 (matches torch.var defaults).
    """
    mean_c = sum_c * (1.0 / n_in)
    in_var = ss_c * (1.0 / (n_in - 1))                        # unbiased, matches torch.var
    # Layer-norm stats derived exactly from the instance-norm partials.
    n_ln = n_ch * n_in
    ln_mean = jnp.sum(sum_c, axis=0, keepdims=True) * (1.0 / n_ln)        # (1, 1)
    dm = mean_c - ln_mean
    ln_ss = (jnp.sum(ss_c, axis=0, keepdims=True)
             + n_in * jnp.sum(dm * dm, axis=0, keepdims=True))
    ln_var = ln_ss * (1.0 / (n_ln - 1))
    inv_in = jax.lax.rsqrt(in_var + eps)                      # (C, 1)
    inv_ln = jax.lax.rsqrt(ln_var + eps)                      # (1, 1)
    scale_c = gr0 * inv_in + gr1 * inv_ln
    bias_c = beta - (gr0 * mean_c * inv_in + gr1 * ln_mean * inv_ln)
    return scale_c, bias_c


# --------------------------------------------------------------------------------------
# Path A: whole (C, HW) slab per batch element, streamed over lane chunks in VMEM
# --------------------------------------------------------------------------------------
def _adailn_whole_kernel(x_ref, gr0_ref, gr1_ref, beta_ref, out_ref, *, eps, n_in, chunk):
    """Single read + single write of x from HBM; stats and apply stream over `chunk`-lane
    slices of the VMEM-resident slab so no (C, HW) f32 temporary is ever materialized."""
    n_ch = x_ref.shape[0]
    n_full = n_in // chunk
    rem = n_in - n_full * chunk
    aligned = (chunk % 128 == 0)

    def lane_off(i):
        off = i * chunk
        return pl.multiple_of(off, 128) if aligned else off

    def chunk_stats(off, cnt):
        xf = x_ref[:, pl.ds(off, cnt)].astype(jnp.float32)     # (C, cnt)
        s = jnp.sum(xf, axis=1, keepdims=True)                 # (C, 1)
        d = xf - s * (1.0 / cnt)
        return s, jnp.sum(d * d, axis=1, keepdims=True)

    def stats_body(i, carry):
        sum_a, m2_a = carry
        s_b, ss_b = chunk_stats(lane_off(i), chunk)
        return _chan_combine(i * chunk, sum_a, m2_a, chunk, s_b, ss_b)

    zero = jnp.zeros((n_ch, 1), jnp.float32)
    sum_c, m2_c = lax.fori_loop(0, n_full, stats_body, (zero, zero))
    if rem:                                                    # static ragged tail
        s_b, ss_b = chunk_stats(n_full * chunk, rem)
        sum_c, m2_c = _chan_combine(n_full * chunk, sum_c, m2_c, rem, s_b, ss_b)

    scale_c, bias_c = _per_channel_scale_bias(
        sum_c, m2_c,
        gr0_ref[...].astype(jnp.float32),
        gr1_ref[...].astype(jnp.float32),
        beta_ref[...].astype(jnp.float32),
        n_in=n_in, n_ch=n_ch, eps=eps)

    def apply_chunk(off, cnt):
        xf = x_ref[:, pl.ds(off, cnt)].astype(jnp.float32)
        out_ref[:, pl.ds(off, cnt)] = (xf * scale_c + bias_c).astype(out_ref.dtype)

    def apply_body(i, carry):
        apply_chunk(lane_off(i), chunk)
        return carry

    lax.fori_loop(0, n_full, apply_body, 0)
    if rem:
        apply_chunk(n_full * chunk, rem)


# --------------------------------------------------------------------------------------
# Path B: spatial-tiled two-sweep (bounded VMEM; stats sweep then apply sweep)
# --------------------------------------------------------------------------------------
def _adailn_tiled_kernel(x_ref, gr0_ref, gr1_ref, beta_ref, out_ref,
                         sum_sc, m2_sc, scale_sc, bias_sc,
                         *, eps, tile, n_tiles, n_in, ragged):
    p = pl.program_id(1)          # 0 = stats sweep, 1 = apply sweep
    t = pl.program_id(2)          # spatial tile index

    @pl.when(jnp.logical_and(p == 0, t == 0))
    def _init():
        sum_sc[...] = jnp.zeros_like(sum_sc)
        m2_sc[...] = jnp.zeros_like(m2_sc)

    @pl.when(p == 0)
    def _stats():
        xf = x_ref[...].astype(jnp.float32)                   # (C, tile)
        if ragged:
            # The last tile is partial: lanes past n_in hold stale buffer contents,
            # so mask them out of the statistics (only compiled in when needed).
            lane = lax.broadcasted_iota(jnp.int32, (1, tile), 1)
            valid = (t * tile + lane) < n_in
            xf = jnp.where(valid, xf, 0.0)
            cnt = jnp.minimum(tile, n_in - t * tile).astype(jnp.float32)
        else:
            cnt = float(tile)
        sum_t = jnp.sum(xf, axis=1, keepdims=True)            # (C, 1)
        d = xf - sum_t / cnt
        if ragged:
            d = jnp.where(valid, d, 0.0)
        ss_t = jnp.sum(d * d, axis=1, keepdims=True)          # (C, 1)
        new_sum, new_m2 = _chan_combine(t * tile, sum_sc[...], m2_sc[...],
                                        cnt, sum_t, ss_t)
        sum_sc[...] = new_sum
        m2_sc[...] = new_m2

    @pl.when(jnp.logical_and(p == 0, t == n_tiles - 1))
    def _finalize():
        scale_c, bias_c = _per_channel_scale_bias(
            sum_sc[...], m2_sc[...],
            gr0_ref[...].astype(jnp.float32),
            gr1_ref[...].astype(jnp.float32),
            beta_ref[...].astype(jnp.float32),
            n_in=n_in, n_ch=sum_sc.shape[0], eps=eps)
        scale_sc[...] = scale_c
        bias_sc[...] = bias_c

    @pl.when(p == 1)
    def _apply():
        # Lanes past n_in in the last partial block are dropped by the pipeline writeback.
        xf = x_ref[...].astype(jnp.float32)
        out_ref[...] = (xf * scale_sc[...] + bias_sc[...]).astype(out_ref.dtype)


# --------------------------------------------------------------------------------------
# Wrapper
# --------------------------------------------------------------------------------------
def _vmem_capacity_bytes():
    try:
        info = pltpu.get_tpu_info()
        cap = getattr(info, "vmem_capacity_bytes", None)
        if cap:
            return int(cap)
    except Exception:
        pass
    # Generation-aware fallback: don't treat 128 MiB parts (v4/v5/v6) as 64 MiB.
    try:
        kind = jax.devices()[0].device_kind.lower()
    except Exception:
        kind = ""
    if "v7" in kind:
        return 64 << 20
    if any(g in kind for g in ("v6", "v5", "v4")):
        return 128 << 20
    return 64 << 20   # conservative default for unknown parts


def _pick_spatial_tile(hw, n_ch, tile_budget_bytes):
    """Largest multiple-of-128 lane tile whose (C, tile) f32 block fits the budget.

    The tile does NOT need to divide hw: the tiled kernel masks the ragged last tile.
    Returns None when hw < 128 (such tiny maps always go through the whole-slab path).
    """
    if hw < 128:
        return None
    max_lanes = max(128, (tile_budget_bytes // (4 * max(n_ch, 1))) // 128 * 128)
    hw_ceil = pl.cdiv(hw, 128) * 128
    return int(min(max_lanes, hw_ceil))


def adailn_forward(x, gamma, beta, rho, eps=EPS, *, force_path=None,
                   tile_budget_bytes=None):
    """adaILN forward (using_bn=False branch).

    x: (B, C, H, W); gamma, beta: (B, C); rho: (1, C, 2) raw (pre-softmax) parameter.
    """
    B, C, H, W = x.shape
    HW = H * W
    out_dtype = x.dtype
    itemsize = jnp.dtype(out_dtype).itemsize
    x3 = x.reshape(B, C, HW)                                   # lane-dense last axis (free)

    # Batch-independent prep hoisted out of the kernel: rho softmax, folded into gamma.
    rho_sm = jax.nn.softmax(rho.astype(jnp.float32), axis=2)   # (1, C, 2)
    gamma_f = gamma.astype(jnp.float32)                        # (B, C)
    gr0 = (gamma_f * rho_sm[:, :, 0]).reshape(B, C, 1)
    gr1 = (gamma_f * rho_sm[:, :, 1]).reshape(B, C, 1)
    beta3 = beta.astype(jnp.float32).reshape(B, C, 1)

    vmem_cap = _vmem_capacity_bytes()

    # Tiled-path (C, tile) f32 block budget derived from the actual VMEM capacity.
    # Resident ~= 2 in + 2 out double-buffers (storage width) + ~2 f32 temporaries
    # in the stats pass, i.e. (itemsize + 2) bytes per f32-block byte; keep <~70% VMEM.
    #   -> ~15 MiB blocks on 128 MiB parts (v5e/v6e), ~7.5 MiB on v7x (64 MiB), for f32.
    if tile_budget_bytes is None:
        tile_budget_bytes = int(0.70 * vmem_cap / (itemsize + 2))
        tile_budget_bytes = max(2 << 20, min(tile_budget_bytes, 16 << 20))
    tile = _pick_spatial_tile(HW, C, tile_budget_bytes)

    # Whole-path in-kernel streaming chunk (lanes): bound the per-chunk f32 temps to ~1.5 MiB.
    if HW < 128:
        chunk = HW
    else:
        by_bytes = max(128, ((3 << 19) // (4 * C)) // 128 * 128)
        chunk = max(128, min((HW // 128) * 128, 2048, by_bytes))

    single_buffer = (B == 1)              # one grid step -> nothing to prefetch
    n_buf = 1 if single_buffer else 2
    # Dtype-aware whole-slab residency: in/out DMA buffers at their storage width plus a
    # few chunk-sized f32 temporaries (no (C, HW) f32 slab is materialized anymore).
    slab = C * HW * itemsize
    whole_need = 2 * n_buf * slab + 3 * C * chunk * 4 + (1 << 20)

    if force_path == "whole":
        use_whole = True
    elif force_path == "tiled":
        use_whole = tile is None
    else:
        # Whole path = 2x slab HBM traffic vs 3x for tiled; prefer it whenever it fits.
        use_whole = (tile is None) or (whole_need <= int(0.80 * vmem_cap))

    # Per-channel params enter as (C, 1) blocks (sublane-major) so they broadcast
    # directly against the (C, lanes) slab with no in-kernel relayout.
    param_spec = pl.BlockSpec((pl.Squeezed(), C, 1), lambda b, *_: (b, 0, 0))

    def _vmem_limit(need):
        # Leave Mosaic headroom: never scope more than ~88% of physical VMEM.
        return int(min(max(need + (8 << 20), 32 << 20), int(0.88 * vmem_cap)))

    if use_whole:
        vmem_limit = _vmem_limit(whole_need)
        kernel = functools.partial(_adailn_whole_kernel, eps=float(eps),
                                   n_in=HW, chunk=chunk)

        def _whole_call(single):
            def slab_spec():
                if single:
                    # B == 1: a single grid step has nothing to prefetch; single-buffer the
                    # slab DMA to halve the whole-path VMEM footprint.
                    return pl.BlockSpec((pl.Squeezed(), C, HW), lambda b: (b, 0, 0),
                                        pipeline_mode=pl.Buffered(1))
                return pl.BlockSpec((pl.Squeezed(), C, HW), lambda b: (b, 0, 0))
            return pl.pallas_call(
                kernel,
                out_shape=jax.ShapeDtypeStruct((B, C, HW), out_dtype),
                grid_spec=pltpu.PrefetchScalarGridSpec(
                    num_scalar_prefetch=0,
                    grid=(B,),
                    in_specs=[slab_spec(), param_spec, param_spec, param_spec],
                    out_specs=slab_spec(),
                ),
                compiler_params=pltpu.CompilerParams(
                    dimension_semantics=("parallel",),
                    vmem_limit_bytes=vmem_limit,
                ),
            )(x3, gr0, gr1, beta3)

        if single_buffer:
            try:
                out3 = _whole_call(True)
            except Exception:
                # pipeline_mode=Buffered(1) unavailable on this build: fall back to the
                # default double-buffering (costs one extra in/out slab of VMEM).
                out3 = _whole_call(False)
        else:
            out3 = _whole_call(False)
    else:
        n_tiles = pl.cdiv(HW, tile)
        ragged = (HW % tile) != 0
        tiled_need = 4 * C * tile * itemsize + 2 * C * tile * 4 + (1 << 20)
        kernel = functools.partial(_adailn_tiled_kernel, eps=float(eps), tile=tile,
                                   n_tiles=n_tiles, n_in=HW, ragged=ragged)
        # TODO(synk): for B == 1 on v7x, additionally split the channel axis across the two
        # TensorCores (per-core instance stats + tiny (C,1) cross-core LN combine via
        # CMEM/VMEM_SHARED) so single-image inference uses both cores.
        out3 = pl.pallas_call(
            kernel,
            out_shape=jax.ShapeDtypeStruct((B, C, HW), out_dtype),
            grid_spec=pltpu.PrefetchScalarGridSpec(
                num_scalar_prefetch=0,
                grid=(B, 2, n_tiles),
                in_specs=[
                    pl.BlockSpec((pl.Squeezed(), C, tile), lambda b, p, t: (b, 0, t)),
                    param_spec, param_spec, param_spec,
                ],
                # During the stats sweep (p==0) the output block index stays pinned to tile 0,
                # so nothing is flushed until the apply sweep writes each tile.  Even a
                # spurious flush of the pinned block is harmless: tile 0 of batch b is
                # rewritten by the kernel at (p==1, t==0) before its final writeback.
                out_specs=pl.BlockSpec((pl.Squeezed(), C, tile),
                                       lambda b, p, t: (b, 0, t * p)),
                scratch_shapes=[
                    pltpu.VMEM((C, 1), jnp.float32),   # per-channel running sum
                    pltpu.VMEM((C, 1), jnp.float32),   # per-channel running centered SS
                    pltpu.VMEM((C, 1), jnp.float32),   # fused scale
                    pltpu.VMEM((C, 1), jnp.float32),   # fused bias
                ],
            ),
            compiler_params=pltpu.CompilerParams(
                dimension_semantics=("parallel", "arbitrary", "arbitrary"),
                vmem_limit_bytes=_vmem_limit(tiled_need),
            ),
        )(x3, gr0, gr1, beta3)

    return out3.reshape(B, C, H, W)


# --------------------------------------------------------------------------------------
# Pure-JAX reference (mirrors the PyTorch forward, unbiased variance)
# --------------------------------------------------------------------------------------
def adailn_reference(x, gamma, beta, rho, eps=EPS):
    x = x.astype(jnp.float32)
    in_mean = jnp.mean(x, axis=(2, 3), keepdims=True)
    in_var = jnp.var(x, axis=(2, 3), keepdims=True, ddof=1)
    out_in = (x - in_mean) / jnp.sqrt(in_var + eps)
    ln_mean = jnp.mean(x, axis=(1, 2, 3), keepdims=True)
    ln_var = jnp.var(x, axis=(1, 2, 3), keepdims=True, ddof=1)
    out_ln = (x - ln_mean) / jnp.sqrt(ln_var + eps)
    rho_sm = jax.nn.softmax(rho.astype(jnp.float32), axis=2)
    rho0 = rho_sm[:, :, 0][:, :, None, None]
    rho1 = rho_sm[:, :, 1][:, :, None, None]
    out = rho0 * out_in + rho1 * out_ln
    return out * gamma[:, :, None, None] + beta[:, :, None, None]


if __name__ == "__main__":
    def make_inputs(key, B, C, H, W):
        kx, kg, kb = jax.random.split(key, 3)
        x = jax.random.normal(kx, (B, C, H, W), dtype=jnp.float32)
        gamma = jax.random.normal(kg, (B, C), dtype=jnp.float32)
        beta = jax.random.normal(kb, (B, C), dtype=jnp.float32)
        # Deterministic parameter init per adaILN.__init__ (using_bn=False):
        # rho[:, :, 0] = 3.2, rho[:, :, 1] = 1.0
        rho = jnp.concatenate(
            [jnp.full((1, C, 1), 3.2, jnp.float32),
             jnp.full((1, C, 1), 1.0, jnp.float32)], axis=2)
        return x, gamma, beta, rho

    keys = jax.random.split(jax.random.PRNGKey(0), 4)

    # 1) Whole-slab path, aligned HW (B=2, C=4, 16x16).
    x, g, b, r = make_inputs(keys[0], 2, 4, 16, 16)
    out = jax.block_until_ready(adailn_forward(x, g, b, r))
    np.testing.assert_allclose(np.asarray(out), np.asarray(adailn_reference(x, g, b, r)),
                               rtol=2e-5, atol=2e-5)

    # 2) Whole-slab path, HW not a multiple of the lane chunk (15x15 -> HW=225):
    #    exercises the ragged-tail branch of the in-kernel streaming loops.
    x, g, b, r = make_inputs(keys[1], 2, 4, 15, 15)
    out = jax.block_until_ready(adailn_forward(x, g, b, r))
    np.testing.assert_allclose(np.asarray(out), np.asarray(adailn_reference(x, g, b, r)),
                               rtol=2e-5, atol=2e-5)

    # 3) Spatial-tiled two-sweep path with a ragged last tile (forced, tiny tile budget):
    #    HW=900 -> tile=128, 8 tiles, last tile has only 4 valid lanes.
    x, g, b, r = make_inputs(keys[2], 2, 8, 30, 30)
    out = jax.block_until_ready(
        adailn_forward(x, g, b, r, force_path="tiled", tile_budget_bytes=8 * 128 * 4))
    np.testing.assert_allclose(np.asarray(out), np.asarray(adailn_reference(x, g, b, r)),
                               rtol=2e-5, atol=2e-5)

    # 4) B == 1 whole-slab path (single-buffered slab DMA when supported).
    x, g, b, r = make_inputs(keys[3], 1, 4, 16, 16)
    out = jax.block_until_ready(adailn_forward(x, g, b, r))
    np.testing.assert_allclose(np.asarray(out), np.asarray(adailn_reference(x, g, b, r)),
                               rtol=2e-5, atol=2e-5)

    print("KERNEL_OK")
</pallas_src>

<mosaic_0001>
module attributes {stable_mosaic.version = 11 : i64} {
  func.func @_adailn_whole_kernel(%arg0: i32, %arg1: memref<1x4x256xf32, #tpu.memory_space<vmem>>, %arg2: memref<1x4x1xf32, #tpu.memory_space<vmem>>, %arg3: memref<1x4x1xf32, #tpu.memory_space<vmem>>, %arg4: memref<1x4x1xf32, #tpu.memory_space<vmem>>, %arg5: memref<1x4x256xf32, #tpu.memory_space<vmem>>) attributes {dimension_semantics = [#tpu.dimension_semantics<parallel>], iteration_bounds = array<i64: 2>, scalar_prefetch = 0 : i64, scratch_operands = 0 : i64, tpu.core_type = #tpu.core_type<tc>, window_params = [{transform_indices = @transform_0, window_bounds = array<i64: 1, 4, 256>}, {transform_indices = @transform_1, window_bounds = array<i64: 1, 4, 1>}, {transform_indices = @transform_2, window_bounds = array<i64: 1, 4, 1>}, {transform_indices = @transform_3, window_bounds = array<i64: 1, 4, 1>}, {transform_indices = @transform_4, window_bounds = array<i64: 1, 4, 256>}]} {
    %cst = arith.constant 0.000000e+00 : f32
    %0 = vector.broadcast %cst : f32 to vector<4x1xf32>
    %c0_i32 = arith.constant 0 : i32
    %c256_i32 = arith.constant 256 : i32
    %1 = arith.muli %c0_i32, %c256_i32 : i32
    %2 = tpu.assume_multiple %1, 128 : i32
    %c0 = arith.constant 0 : index
    %c0_0 = arith.constant 0 : index
    %3 = arith.index_cast %2 : i32 to index
    %4 = vector.load %arg1[%c0, %c0_0, %3] : memref<1x4x256xf32, #tpu.memory_space<vmem>>, vector<1x4x256xf32>
    %5 = vector.shape_cast %4 : vector<1x4x256xf32> to vector<4x256xf32>
    %cst_1 = arith.constant dense<0.000000e+00> : vector<4xf32>
    %6 = vector.multi_reduction <add>, %5, %cst_1 [1] : vector<4x256xf32> to vector<4xf32>
    %7 = vector.shape_cast %6 : vector<4xf32> to vector<4x1xf32>
    %cst_2 = arith.constant 3.906250e-03 : f32
    %8 = vector.broadcast %cst_2 : f32 to vector<4x1xf32>
    %9 = arith.mulf %7, %8 : vector<4x1xf32>
    %10 = vector.broadcast %9 : vector<4x1xf32> to vector<4x256xf32>
    %11 = arith.subf %5, %10 : vector<4x256xf32>
    %12 = arith.mulf %11, %11 : vector<4x256xf32>
    %cst_3 = arith.constant dense<0.000000e+00> : vector<4xf32>
    %13 = vector.multi_reduction <add>, %12, %cst_3 [1] : vector<4x256xf32> to vector<4xf32>
    %14 = vector.shape_cast %13 : vector<4xf32> to vector<4x1xf32>
    %c256_i32_4 = arith.constant 256 : i32
    %15 = arith.muli %c0_i32, %c256_i32_4 : i32
    %16 = arith.sitofp %15 : i32 to f32
    %cst_5 = arith.constant 1.000000e+00 : f32
    %17 = arith.maximumf %16, %cst_5 : f32
    %18 = vector.broadcast %17 : f32 to vector<4x1xf32>
    %19 = arith.divf %0, %18 : vector<4x1xf32>
    %cst_6 = arith.constant 2.560000e+02 : f32
    %20 = vector.broadcast %cst_6 : f32 to vector<4x1xf32>
    %21 = arith.divf %7, %20 : vector<4x1xf32>
    %22 = arith.subf %21, %19 : vector<4x1xf32>
    %cst_7 = arith.constant 2.560000e+02 : f32
    %23 = arith.mulf %16, %cst_7 : f32
    %cst_8 = arith.constant 2.560000e+02 : f32
    %24 = arith.addf %16, %cst_8 : f32
    %25 = arith.divf %23, %24 : f32
    %26 = arith.addf %0, %7 : vector<4x1xf32>
    %27 = arith.addf %0, %14 : vector<4x1xf32>
    %28 = arith.mulf %22, %22 : vector<4x1xf32>
    %29 = vector.broadcast %25 : f32 to vector<4x1xf32>
    %30 = arith.mulf %28, %29 : vector<4x1xf32>
    %31 = arith.addf %27, %30 : vector<4x1xf32>
    %c1_i32 = arith.constant 1 : i32
    %c0_9 = arith.constant 0 : index
    %c0_10 = arith.constant 0 : index
    %c0_11 = arith.constant 0 : index
    %32 = vector.load %arg2[%c0_9, %c0_10, %c0_11] : memref<1x4x1xf32, #tpu.memory_space<vmem>>, vector<1x4x1xf32>
    %33 = vector.shape_cast %32 : vector<1x4x1xf32> to vector<4x1xf32>
    %c0_12 = arith.constant 0 : index
    %c0_13 = arith.constant 0 : index
    %c0_14 = arith.constant 0 : index
    %34 = vector.load %arg3[%c0_12, %c0_13, %c0_14] : memref<1x4x1xf32, #tpu.memory_space<vmem>>, vector<1x4x1xf32>
    %35 = vector.shape_cast %34 : vector<1x4x1xf32> to vector<4x1xf32>
    %c0_15 = arith.constant 0 : index
    %c0_16 = arith.constant 0 : index
    %c0_17 = arith.constant 0 : index
    %36 = vector.load %arg4[%c0_15, %c0_16, %c0_17] : memref<1x4x1xf32, #tpu.memory_space<vmem>>, vector<1x4x1xf32>
    %37 = vector.shape_cast %36 : vector<1x4x1xf32> to vector<4x1xf32>
    %cst_18 = arith.constant 3.906250e-03 : f32
    %38 = vector.broadcast %cst_18 : f32 to vector<4x1xf32>
    %39 = arith.mulf %26, %38 : vector<4x1xf32>
    %cst_19 = arith.constant 0.00392156886 : f32
    %40 = vector.broadcast %cst_19 : f32 to vector<4x1xf32>
    %41 = arith.mulf %31, %40 : vector<4x1xf32>
    %cst_20 = arith.constant dense<0.000000e+00> : vector<1xf32>
    %42 = vector.multi_reduction <add>, %26, %cst_20 [0] : vector<4x1xf32> to vector<1xf32>
    %43 = vector.shape_cast %42 : vector<1xf32> to vector<1x1xf32>
    %cst_21 = arith.constant 9.765625E-4 : f32
    %44 = vector.broadcast %cst_21 : f32 to vector<1x1xf32>
    %45 = arith.mulf %43, %44 : vector<1x1xf32>
    %46 = vector.broadcast %45 : vector<1x1xf32> to vector<4x1xf32>
    %47 = arith.subf %39, %46 : vector<4x1xf32>
    %cst_22 = arith.constant dense<0.000000e+00> : vector<1xf32>
    %48 = vector.multi_reduction <add>, %31, %cst_22 [0] : vector<4x1xf32> to vector<1xf32>
    %49 = vector.shape_cast %48 : vector<1xf32> to vector<1x1xf32>
    %50 = arith.mulf %47, %47 : vector<4x1xf32>
    %cst_23 = arith.constant dense<0.000000e+00> : vector<1xf32>
    %51 = vector.multi_reduction <add>, %50, %cst_23 [0] : vector<4x1xf32> to vector<1xf32>
    %52 = vector.shape_cast %51 : vector<1xf32> to vector<1x1xf32>
    %cst_24 = arith.constant 2.560000e+02 : f32
    %53 = vector.broadcast %cst_24 : f32 to vector<1x1xf32>
    %54 = arith.mulf %53, %52 : vector<1x1xf32>
    %55 = arith.addf %49, %54 : vector<1x1xf32>
    %cst_25 = arith.constant 9.77517105E-4 : f32
    %56 = vector.broadcast %cst_25 : f32 to vector<1x1xf32>
    %57 = arith.mulf %55, %56 : vector<1x1xf32>
    %cst_26 = arith.constant 9.99999974E-6 : f32
    %58 = vector.broadcast %cst_26 : f32 to vector<4x1xf32>
    %59 = arith.addf %41, %58 : vector<4x1xf32>
    %60 = math.rsqrt %59 : vector<4x1xf32>
    %cst_27 = arith.constant 9.99999974E-6 : f32
    %61 = vector.broadcast %cst_27 : f32 to vector<1x1xf32>
    %62 = arith.addf %57, %61 : vector<1x1xf32>
    %63 = math.rsqrt %62 : vector<1x1xf32>
    %64 = arith.mulf %33, %60 : vector<4x1xf32>
    %65 = vector.broadcast %63 : vector<1x1xf32> to vector<4x1xf32>
    %66 = arith.mulf %35, %65 : vector<4x1xf32>
    %67 = arith.addf %64, %66 : vector<4x1xf32>
    %68 = arith.mulf %33, %39 : vector<4x1xf32>
    %69 = arith.mulf %68, %60 : vector<4x1xf32>
    %70 = vector.broadcast %45 : vector<1x1xf32> to vector<4x1xf32>
    %71 = arith.mulf %35, %70 : vector<4x1xf32>
    %72 = vector.broadcast %63 : vector<1x1xf32> to vector<4x1xf32>
    %73 = arith.mulf %71, %72 : vector<4x1xf32>
    %74 = arith.addf %69, %73 : vector<4x1xf32>
    %75 = arith.subf %37, %74 : vector<4x1xf32>
    %c0_i32_28 = arith.constant 0 : i32
    %c256_i32_29 = arith.constant 256 : i32
    %76 = arith.muli %c0_i32_28, %c256_i32_29 : i32
    %77 = tpu.assume_multiple %76, 128 : i32
    %c0_30 = arith.constant 0 : index
    %c0_31 = arith.constant 0 : index
    %78 = arith.index_cast %77 : i32 to index
    %79 = vector.load %arg1[%c0_30, %c0_31, %78] : memref<1x4x256xf32, #tpu.memory_space<vmem>>, vector<1x4x256xf32>
    %80 = vector.shape_cast %79 : vector<1x4x256xf32> to vector<4x256xf32>
    %81 = vector.broadcast %67 : vector<4x1xf32> to vector<4x256xf32>
    %82 = arith.mulf %80, %81 : vector<4x256xf32>
    %83 = vector.broadcast %75 : vector<4x1xf32> to vector<4x256xf32>
    %84 = arith.addf %82, %83 : vector<4x256xf32>
    %c0_32 = arith.constant 0 : index
    %c0_33 = arith.constant 0 : index
    %85 = arith.index_cast %77 : i32 to index
    %86 = vector.load %arg5[%c0_32, %c0_33, %85] : memref<1x4x256xf32, #tpu.memory_space<vmem>>, vector<1x4x256xf32>
    %87 = vector.shape_cast %86 : vector<1x4x256xf32> to vector<4x256xf32>
    %88 = vector.shape_cast %84 : vector<4x256xf32> to vector<1x4x256xf32>
    tpu.vector_store %arg5[%c0_32, %c0_33, %85], %88 {strides = array<i32>} : memref<1x4x256xf32, #tpu.memory_space<vmem>>, vector<1x4x256xf32>,
    %c1_i32_34 = arith.constant 1 : i32
    return
  }
  func.func @transform_0(%arg0: i32) -> (i32, i32, i32) {
    %c0_i32 = arith.constant 0 : i32
    %c0_i32_0 = arith.constant 0 : i32
    %c0_i32_1 = arith.constant 0 : i32
    return %arg0, %c0_i32, %c0_i32_0 : i32, i32, i32
  }
  func.func @transform_1(%arg0: i32) -> (i32, i32, i32) {
    %c0_i32 = arith.constant 0 : i32
    %c0_i32_0 = arith.constant 0 : i32
    %c0_i32_1 = arith.constant 0 : i32
    return %arg0, %c0_i32, %c0_i32_0 : i32, i32, i32
  }
  func.func @transform_2(%arg0: i32) -> (i32, i32, i32) {
    %c0_i32 = arith.constant 0 : i32
    %c0_i32_0 = arith.constant 0 : i32
    %c0_i32_1 = arith.constant 0 : i32
    return %arg0, %c0_i32, %c0_i32_0 : i32, i32, i32
  }
  func.func @transform_3(%arg0: i32) -> (i32, i32, i32) {
    %c0_i32 = arith.constant 0 : i32
    %c0_i32_0 = arith.constant 0 : i32
    %c0_i32_1 = arith.constant 0 : i32
    return %arg0, %c0_i32, %c0_i32_0 : i32, i32, i32
  }
  func.func @transform_4(%arg0: i32) -> (i32, i32, i32) {
    %c0_i32 = arith.constant 0 : i32
    %c0_i32_0 = arith.constant 0 : i32
    %c0_i32_1 = arith.constant 0 : i32
    return %arg0, %c0_i32, %c0_i32_0 : i32, i32, i32
  }
}

</mosaic_0001>

<bundles_post_ra>
// kernel: tpu_custom_call.1
= control target key start
LH: loop header
LB: loop body
LE: loop exit
PB: predicated region body
PF: predicated region fallthrough
CT: control target
= control target key end

     0   :  { %9 = vsyncpa [#allocation3], 0  ;;  %s756_s0 = inlined_call_operand.vmem [shape: f32[2,4,256], index: 0, kind: input, shape index: {}]   ;;  %s757_s1 = inlined_call_operand.vmem [shape: f32[2,4,1], index: 1, kind: input, shape index: {}]   ;;  %s758_s2 = inlined_call_operand.vmem [shape: f32[2,4,1], index: 2, kind: input, shape index: {}]   ;;  %s759_s3 = inlined_call_operand.vmem [shape: f32[2,4,1], index: 3, kind: input, shape index: {}]   ;;  %s760_s4 = inlined_call_operand.hbm [shape: f32[2,4,256], index: 4, kind: output, shape index: {}]  }
   0x1   :  { %11 = vsyncpa [#allocation3 + $0x1], 0  ;;  %s623_s15 = smov 0   ;;  %s625_s16 = smov 0  }
   0x2   :  { %s627_s17 = smov 0   ;;  %s629_s18 = smov 0  }
   0x3 LB: > { %s644_s19 = sadd.s32 4294967295, %s593_s18   ;;  %s466_s20 = sadd.s32 4294967294, %s593_s18   ;;  %s593_s18 = sphi %s629_s18, %s766_s18   ;;  %s589_s17 = sphi %s627_s17, %s765_s17   ;;  %s585_s16 = sphi %s625_s16, %s764_s16   ;;  %s581_s15 = sphi %s623_s15, %s763_s15  }
   0x4   : > { %s648_s21 = sadd.s32 1, %s593_s18   ;;  %s128_s22 = sadd.s32 1, %s589_s17 }
   0x5   : > { %s125_s23 = ssub.s32 %s593_s18, %s648_s21  ;;  %p138_p0 = scmp.ne.s32.totalorder %s589_s17, %s585_s16 }
   0x6   : > { %p126_p1 = scmp.eq.s32.totalorder %s125_s23, 0  ;;  %p139_p2 = scmp.eq.s32.totalorder %s644_s19, 1 }
   0x7   : > { %p144_p3 = scmp.ne.s32.totalorder %s585_s16, %s581_s15  ;;  %p145_p4 = scmp.eq.s32.totalorder %s466_s20, 1 }
   0x8   : > { %s659_s24 = scalar_select %p126_p1, %s589_s17, %s128_s22  }
   0x9   : > { %p661_p5 = por %p139_p2, %p138_p0  ;;  %p665_p6 = por %p145_p4, %p144_p3 }
   0xa   : > { %p469_p7 = scmp.ge.s32.totalorder %s593_s18, 1  ;;  %p192_p8 = scmp.lt.s32.totalorder %s593_s18, 3 }
   0xc   : > { %p193_p9 = pnand %p469_p7, %p192_p8 }
   0xd   : > { %p230_p10 = scmp.lt.s32.totalorder (!%p193_p9), %s644_s19, 1  ;;  %vm251_vm0 = vcmask (!%p193_p9), 1043456   ;;  %v595_v5 = vmov (!%p193_p9), 839922192   ;;  %v262_v7 = vlaneseq (!%p193_p9)  ;;  %v596_v22 = vmov (!%p193_p9), 0   ;;  %s227_s22 = sand.u32 (!%p193_p9), 1, %s585_s16  }
   0xe   : > { %196 = sbr.rel (%p193_p9) target bundleno = 514 (0x202), region = 36  ;;  %v260_v6 = vunpack.c.l.s4 (!%p193_p9), %v595_v5  ;;  %524 = vset.pattern.permute.xlu1 (!%p193_p9), %v596_v22  ;;  %525 = vset.pattern.permute.xlu0 (!%p193_p9), %v596_v22  ;;  %s470_s23 = sshll.u32 (!%p193_p9), %s227_s22, 3 }
   0xf   : > { %v263_v9 = vshrl.u32 (!%p193_p9), %v262_v7, 7  ;;  %s357_s7 = scalar_lea.sflag (!%p193_p9), [#allocation3], %s227_s22  ;;  %s597_s8 = smov (!%p193_p9), [#allocation2]  }
  0x10   : > { %v261_v8 = vunpack.c.0.s8 (!%p193_p9), %v260_v6 }
  0x12   : > { %v689_v10 = vsub.s32 (!%p193_p9), %v261_v8, %v263_v9 }
  0x15   : > { %s231_s27 = scalar_select %p230_p10, %s644_s19, 1 }
  0x17   : > { %s481_s28 = sshll.u32 %s231_s27, 3  ;;  %s683_s6 = sshll.u32 %s231_s27, 2 }
  0x18   : > { %s234_s5 = scalar_lea.vmem %s756_s0, %s481_s28  ;;  %s238_s9 = scalar_lea.vmem %s757_s1, %s683_s6 }
  0x19   : > { %v676_v0 = vld [vmem:[%s234_s5] sm:$0xff]  ;;  %s242_s12 = scalar_lea.vmem %s758_s2, %s683_s6  ;;  %s246_s20 = scalar_lea.vmem %s759_s3, %s683_s6 }
  0x1a   : > { %v249_v1 = vcombine.high %v676_v0, %v676_v0  ;;  %v252_v2 = vsel %vm251_vm0, %v676_v0, 0.0  ;;  %v284_v12 = vld [vmem:[%s238_s9] sm:$0xf]  ;;  %s482_s27 = sshll.u32 %s644_s19, 7  ;;  %s229_s28 = scalar_lea.vmem [#allocation2], %s470_s23 }
  0x1b   : > { %v285_v60 = vld [vmem:[%s242_s12] sm:$0xf]  ;;  %s371_s29 = sshll.u32 %s229_s28, 4  ;;  %s714_s6 = scalar_lea.hbm %s760_s4, %s482_s27  ;;  %s716_s29 = int_to_ptr.vmem [resolvable:$true] %s371_s29 }
  0x1c   : > { %v253_v3 = vsel %vm251_vm0, %v249_v1, 0.0  ;;  %s531_s19 = scalar_lea.vmem %s716_s29, 128  ;;  %s535_s9 = sshll.u32 %s597_s8, 4  ;;  %s536_s9 = int_to_ptr.vmem [resolvable:$false] %s535_s9 }
  0x1d   : > { %v254_v4 = vadd.f32 %v253_v3, %v252_v2  ;;  %v286_v2 = vld [vmem:[%s246_s20] sm:$0xf]  ;;  %p532_p11 = scmp.ne.s32.totalorder %s716_s29, %s531_s19  ;;  %s537_s10 = scalar_lea.vmem %s536_s9, 256 }
  0x1e   : > { %p538_p0 = scmp.lt.s32.totalorder %s716_s29, %s536_s9  ;;  %p539_p1 = scmp.lt.s32.totalorder %s537_s10, %s531_s19 }
  0x1f   : > { %255 = vadd.xlane.f32.xlu0 %v254_v4  ;;  %p533_p12 = pnand %p532_p11, %p661_p5 }
  0x20   : > { %p540_p2 = por %p539_p1, %p538_p0 }
  0x21   : > { %p534_p13 = pneg %p533_p12 }
  0x23   : > { %p541_p3 = pnand %p540_p2, %p534_p13 }
  0xac   : > { %v256_v11 = vpop.xlane.xlu0 %255 }
  0xad   : > { %v257_v13 = vmul.f32 0.00390625, %v256_v11  ;;  %v289_v23 = vsel %vm251_vm0, %v256_v11, 0.0 }
  0xae   : > { %v290_v24 = vrot.slane %v289_v23, 4 }
  0xaf   : > { %v265_v14 = vrot.slane %v257_v13, %v689_v10  ;;  %v323_v15 = vmul.f32 %v284_v12, %v257_v13  ;;  %v281_v36 = vmul.f32 %v257_v13, %v257_v13 }
  0xb0   : > { %v291_v25 = vadd.f32 %v290_v24, %v289_v23 }
  0xb1   : > { %v267_v16 = vsub.f32 %v676_v0, %v265_v14  ;;  %v282_v38 = vmul.f32 0.0, %v281_v36 }
  0xb2   : > { %v292_v26 = vrot.slane %v291_v25, 2 }
  0xb3   : > { %v268_v17 = vmul.f32 %v267_v16, %v267_v16 }
  0xb4   : > { %v293_v27 = vadd.f32 %v292_v26, %v291_v25 }
  0xb5   : > { %v270_v18 = vcombine.high %v268_v17, %v268_v17  ;;  %v272_v19 = vsel %vm251_vm0, %v268_v17, 0.0 }
  0xb6   : > { %v294_v28 = vrot.slane %v293_v27, 1 }
  0xb7   : > { %v273_v20 = vsel %vm251_vm0, %v270_v18, 0.0 }
  0xb8   : > { %v274_v21 = vadd.f32 %v273_v20, %v272_v19  ;;  %v295_v29 = vadd.f32 %v294_v28, %v293_v27 }
  0xba   : > { %275 = vadd.xlane.f32.xlu0 %v274_v21  ;;  %v296_v30 = vmul.f32 0.0009765625, %v295_v29 }
  0xbc   : > { %v297_v31 = vsub.f32 %v257_v13, %v296_v30  ;;  %v325_v61 = vmul.f32 %v296_v30, %v285_v60 }
  0xbe   : > { %v305_v32 = vmul.f32 %v297_v31, %v297_v31 }
  0xc0   : > { %v306_v33 = vsel %vm251_vm0, %v305_v32, 0.0 }
  0xc1   : > { %v307_v34 = vrot.slane %v306_v33, 4 }
  0xc3   : > { %v308_v35 = vadd.f32 %v307_v34, %v306_v33 }
  0xc5   : > { %v309_v37 = vrot.slane %v308_v35, 2 }
  0xc7   : > { %v310_v41 = vadd.f32 %v309_v37, %v308_v35 }
  0xc9   : > { %v311_v47 = vrot.slane %v310_v41, 1 }
  0xcb   : > { %v312_v50 = vadd.f32 %v311_v47, %v310_v41 }
  0xcd   : > { %v313_v53 = vmul.f32 256.0, %v312_v50 }
 0x147   : > { %v276_v39 = vpop.xlane.xlu0 %275 }
 0x148   : > { %v283_v40 = vadd.f32 %v282_v38, %v276_v39 }
 0x14a   : > { %v288_v42 = vmul.f32 0.003921569, %v283_v40  ;;  %v298_v43 = vsel %vm251_vm0, %v283_v40, 0.0 }
 0x14b   : > { %v299_v44 = vrot.slane %v298_v43, 4 }
 0x14c   : > { %v316_v45 = vadd.f32 1e-05, %v288_v42 }
 0x14d   : > { %v300_v46 = vadd.f32 %v299_v44, %v298_v43 }
 0x14e   : > { %527 = vrsqrt.f32 %v316_v45 }
 0x14f   : > { %v301_v48 = vrot.slane %v300_v46, 2 }
 0x151   : > { %v302_v49 = vadd.f32 %v301_v48, %v300_v46 }
 0x153   : > { %v303_v51 = vrot.slane %v302_v49, 1 }
 0x155   : > { %v304_v52 = vadd.f32 %v303_v51, %v302_v49 }
 0x157   : > { %v314_v54 = vadd.f32 %v313_v53, %v304_v52 }
 0x158   : > { %v528_v55 = vpop.eup %527 }
 0x159   : > { %v315_v56 = vmul.f32 0.0009775171, %v314_v54  ;;  %v320_v57 = vmul.f32 %v528_v55, %v284_v12  ;;  %v324_v58 = vmul.f32 %v528_v55, %v323_v15 }
 0x15b   : > { %v318_v59 = vadd.f32 1e-05, %v315_v56 }
 0x15d   : > { %529 = vrsqrt.f32 %v318_v59 }
 0x167   : > { %v530_v62 = vpop.eup %529 }
 0x168   : > { %v321_v63 = vmul.f32 %v530_v62, %v285_v60  ;;  %v326_v1 = vmul.f32 %v530_v62, %v325_v61 }
 0x16a   : > { %v322_v3 = vadd.f32 %v321_v63, %v320_v57  ;;  %v327_v4 = vadd.f32 %v326_v1, %v324_v58 }
 0x16c   : > { %331 = vperm.xlu1 %524, %v322_v3   ;;  %v328_v5 = vsub.f32 %v286_v2, %v327_v4 }
 0x170   : > { %344 = vperm.xlu1 %524, %v328_v5  }
 0x1eb   : > { %v332_v6 = vpop.permute.xlu1 %331 }
 0x1ec   : > { %v339_v7 = vrot.slane %v332_v6, %v689_v10 }
 0x1ee   : > { %v341_v9 = vmul.f32 %v339_v7, %v676_v0 }
 0x1ef   : > { %v345_v8 = vpop.permute.xlu1 %344 }
 0x1f0   : > { %v352_v11 = vrot.slane %v345_v8, %v689_v10 }
 0x1f2   : > { %v354_v12 = vadd.f32 %v352_v11, %v341_v9 }
 0x1f4   : > { %355 = vst [vmem:[%s229_s28] sm:$0xff] %v354_v12 }
 0x1f5   : > { %544 = shalt.err (!%p541_p3)
}
 0x1f6   : > { %s545_s11 = scalar_lea.hbm %s714_s6, 128  ;;  %s549_s14 = scalar_lea.hbm %s760_s4, 256 }
 0x1f7   : > { %p546_p4 = scmp.ne.s32.totalorder %s714_s6, %s545_s11  ;;  %p550_p9 = scmp.lt.u32.totalorder %s714_s6, %s760_s4 }
 0x1f8   : > { %p551_p10 = scmp.lt.u32.totalorder %s549_s14, %s545_s11  ;;  %p553_p12 = scmp.lt.u32.totalorder %s545_s11, %s714_s6 }
 0x1f9   : > { %p547_p7 = pnand %p546_p4, %p661_p5 }
 0x1fa   : > { %p552_p11 = por %p551_p10, %p550_p9 }
 0x1fb   : > { %p548_p8 = pneg %p547_p7 }
 0x1fc   : > { %p554_p13 = por %p553_p12, %p552_p11 }
 0x1fe   : > { %p555_p0 = pnand %p554_p13, %p548_p8 }
 0x200   : > { %558 = shalt.err (!%p555_p0)
}
 0x201   : > { %483 = dma.vmem_to_hbm [thread:$0]  (%p661_p5), %s716_s29, 128, %s714_s6, %s357_s7  }
 0x202 PF: > { %p489_p1 = scmp.ge.s32.totalorder %s593_s18, 2  ;;  %s383_s23 = sand.u32 1, %s581_s15  }
 0x203   : > { %s384_s27 = scalar_lea.sflag [#allocation3], %s383_s23 }
 0x204   : > { %p486_p2 = pnand %p489_p1, %p665_p6 }
 0x206   : > { %576 = dma.done.wait (!%p486_p2), %s384_s27, 128  }
 0x207   : > { %578 = vsyncadd (!%p486_p2), %s384_s27, 4294967168  ;;  %p14_p3 = scmp.ge.s32.totalorder %s648_s21, 4   ;;  %s763_s15 = smov %s585_s16 }
 0x208   : > { %s764_s16 = smov %s589_s17  ;;  %s765_s17 = smov %s659_s24 }
 0x209   : > { %s766_s18 = smov %s648_s21  ;;  %16 = sbr.rel (!%p14_p3) target bundleno = 3 (0x3), region = 80 }
 0x210   :  { %389 = vsyncpa [#allocation3], 1 }
 0x211   :  { %391 = vsyncpa [#allocation3 + $0x1], 1 }

</bundles_post_ra>
